<compile_context>
chip_gen: v5e
topology: v5e:2x2
jax: 0.10.0
libtpu: 0.0.40
codegen_flags: <defaults>
</compile_context>

<pallas_src>
import math
import functools

import jax
import jax.numpy as jnp
from jax.experimental import pallas as pl
from jax.experimental.pallas import tpu as pltpu


def _cycle_shifts(in_channels, kernel_size):
    kh, kw = kernel_size
    assert kh == 1 or kw == 1, kernel_size
    K = kh * kw
    start = K // 2
    return [(i + start) % K - K // 2 for i in range(in_channels)], K


def _pick_chunk(n, target=512):
    """Largest divisor of n that is <= target (>=128), else n (single chunk)."""
    if n <= target:
        return n
    for c in range(target, 127, -1):
        if n % c == 0:
            return c
    return n


@functools.partial(jax.jit, static_argnames=("kernel_size",))
def cyclefc_forward(x_nchw, weight, bias, kernel_size):
    """CycleFC forward. x_nchw: (B, C, H, W); weight: (Co, C, 1, 1); bias: (Co,) or None."""
    B, C, H, W = x_nchw.shape
    Co = weight.shape[0]
    kh, kw = kernel_size
    shifts, K = _cycle_shifts(C, kernel_size)

    # Shift stride along the flattened H*W axis: (1,K) shifts W (stride 1),
    # (K,1) shifts H (stride W).
    stride = 1 if kh == 1 else W
    ext = W if kh == 1 else H          # spatial extent along the shifted axis
    HW = H * W
    dtype = x_nchw.dtype

    lp = (K // 2) * stride
    rp = (K - 1 - K // 2) * stride
    HWp = HW + lp + rp

    # Flatten spatial dims (free for contiguous NCHW) and zero-pad the
    # flattened axis so every tap is a static in-bounds slice in the kernel.
    x_flat = x_nchw.reshape(B, C, HW)
    x_pad = jnp.pad(x_flat, ((0, 0), (0, 0), (lp, rp)))

    # Parameters (kept in the input dtype; bias add stays f32).
    w2 = weight[:, :, 0, 0].astype(dtype)                       # (Co, C)
    if bias is None:
        b2 = jnp.zeros((Co, 1), jnp.float32)
    else:
        b2 = bias.reshape(Co, 1).astype(jnp.float32)

    # Small integer helper arrays (no in-kernel div/mod needed).
    pos = jnp.arange(HW, dtype=jnp.int32)
    q = (pos % W if stride == 1 else pos).reshape(1, HW)        # OOB-mask coordinate
    cres = (jnp.arange(C, dtype=jnp.int32) % K).reshape(C, 1)   # channel residue mod K

    # Distinct shifts actually present; shifts that fall fully outside the
    # image contribute zero and are skipped.
    used = sorted(set(shifts))
    taps = tuple(d for d in used if -ext < d < ext)
    bound = ext * stride               # W (width shift) or H*W (height shift)

    CH = _pick_chunk(HW)
    chunk_starts = tuple(range(0, HW, CH))

    def kernel(x_ref, w_ref, b_ref, cres_ref, q_ref, o_ref):
        # x_ref: (C, HWp)  w_ref: (Co, C)  b_ref: (Co, 1) f32
        # cres_ref: (C, 1) i32  q_ref: (1, HW) i32  o_ref: (Co, HW)
        w = w_ref[...]
        b = b_ref[...]
        cmod = cres_ref[...]
        for c0 in chunk_starts:                         # static unroll over lane chunks
            clen = min(CH, HW - c0)
            qc = q_ref[:, c0:c0 + clen]                 # (1, clen)
            # Shift-gather: xs[c, l] = x[c, l + shift(c)] (zero if out of image).
            xs = jnp.zeros((C, clen), dtype)
            for d in taps:                              # static unroll over distinct shifts
                s = d * stride
                sh = x_ref[:, lp + s + c0: lp + s + c0 + clen]          # (C, clen)
                ok = (cmod == (d % K)) & (qc + s >= 0) & (qc + s < bound)
                xs = jnp.where(ok, sh, xs)
            # One unmasked MXU matmul with f32 accumulation, bias in f32.
            acc = jnp.dot(w, xs, preferred_element_type=jnp.float32)   # (Co, clen)
            o_ref[:, c0:c0 + clen] = (acc + b).astype(o_ref.dtype)

    out_flat = pl.pallas_call(
        kernel,
        out_shape=jax.ShapeDtypeStruct((B, Co, HW), dtype),
        grid=(B,),
        in_specs=[
            pl.BlockSpec((None, C, HWp), lambda b: (b, 0, 0)),   # one padded image
            pl.BlockSpec((Co, C), lambda b: (0, 0)),             # weights (constant block)
            pl.BlockSpec((Co, 1), lambda b: (0, 0)),             # bias
            pl.BlockSpec((C, 1), lambda b: (0, 0)),              # channel residues
            pl.BlockSpec((1, HW), lambda b: (0, 0)),             # flattened coords
        ],
        out_specs=pl.BlockSpec((None, Co, HW), lambda b: (b, 0, 0)),
        compiler_params=pltpu.CompilerParams(
            dimension_semantics=("parallel",),
            vmem_limit_bytes=48 * 1024 * 1024,
        ),
    )(x_pad, w2, b2, cres, q)

    return out_flat.reshape(B, Co, H, W)


def cyclefc_reference(x, weight, bias, kernel_size):
    """Pure-JAX reference (integer-offset deform_conv2d with 1x1 weight)."""
    B, C, H, W = x.shape
    shifts, K = _cycle_shifts(C, kernel_size)
    kh, kw = kernel_size
    P = K
    xp = jnp.pad(x, ((0, 0), (0, 0), (P, P), (P, P)))
    chans = []
    for i, s in enumerate(shifts):
        dy, dx = (s, 0) if kh != 1 else (0, s)
        chans.append(xp[:, i, P + dy:P + dy + H, P + dx:P + dx + W])
    xs = jnp.stack(chans, axis=1)                          # (B, C, H, W) shifted
    out = jnp.einsum('bchw,oc->bohw', xs, weight[:, :, 0, 0])
    if bias is not None:
        out = out + bias[None, :, None, None]
    return out


if __name__ == "__main__":
    B, Cin, Cout, H, W = 2, 4, 8, 16, 16
    key = jax.random.PRNGKey(0)
    for ks in [(1, 7), (5, 1)]:
        key, k_x, k_w, k_b = jax.random.split(key, 4)
        x = jax.random.normal(k_x, (B, Cin, H, W), jnp.float32)
        # Deterministic init mirroring reset_parameters(): kaiming_uniform(a=sqrt(5))
        # on a (Co, C, 1, 1) weight gives bound = 1/sqrt(fan_in) with fan_in = C.
        bound = 1.0 / math.sqrt(Cin)
        weight = jax.random.uniform(k_w, (Cout, Cin, 1, 1), jnp.float32, -bound, bound)
        bias = jax.random.uniform(k_b, (Cout,), jnp.float32, -bound, bound)

        out = jax.block_until_ready(cyclefc_forward(x, weight, bias, ks))
        ref = cyclefc_reference(x, weight, bias, ks)
        assert out.shape == (B, Cout, H, W), out.shape
        err = float(jnp.max(jnp.abs(out - ref)))
        assert jnp.allclose(out, ref, atol=1e-5, rtol=1e-5), err
    print("KERNEL_OK")
</pallas_src>

<mosaic_0001>
module attributes {stable_mosaic.version = 11 : i64} {
  func.func @kernel(%arg0: i32, %arg1: memref<1x4x262xf32, #tpu.memory_space<vmem>>, %arg2: memref<8x4xf32, #tpu.memory_space<vmem>>, %arg3: memref<8x1xf32, #tpu.memory_space<vmem>>, %arg4: memref<4x1xi32, #tpu.memory_space<vmem>>, %arg5: memref<1x256xi32, #tpu.memory_space<vmem>>, %arg6: memref<1x8x256xf32, #tpu.memory_space<vmem>>) attributes {dimension_semantics = [#tpu.dimension_semantics<parallel>], iteration_bounds = array<i64: 2>, scalar_prefetch = 0 : i64, scratch_operands = 0 : i64, tpu.core_type = #tpu.core_type<tc>, window_params = [{transform_indices = @transform_0, window_bounds = array<i64: 1, 4, 262>}, {pipeline_mode = #tpu.pipeline_mode<synchronous>, transform_indices = @transform_1, window_bounds = array<i64: 8, 4>}, {pipeline_mode = #tpu.pipeline_mode<synchronous>, transform_indices = @transform_2, window_bounds = array<i64: 8, 1>}, {pipeline_mode = #tpu.pipeline_mode<synchronous>, transform_indices = @transform_3, window_bounds = array<i64: 4, 1>}, {pipeline_mode = #tpu.pipeline_mode<synchronous>, transform_indices = @transform_4, window_bounds = array<i64: 1, 256>}, {transform_indices = @transform_5, window_bounds = array<i64: 1, 8, 256>}]} {
    %c0 = arith.constant 0 : index
    %c0_0 = arith.constant 0 : index
    %0 = vector.load %arg2[%c0, %c0_0] : memref<8x4xf32, #tpu.memory_space<vmem>>, vector<8x4xf32>
    %c0_1 = arith.constant 0 : index
    %c0_2 = arith.constant 0 : index
    %1 = vector.load %arg3[%c0_1, %c0_2] : memref<8x1xf32, #tpu.memory_space<vmem>>, vector<8x1xf32>
    %c0_3 = arith.constant 0 : index
    %c0_4 = arith.constant 0 : index
    %2 = vector.load %arg4[%c0_3, %c0_4] : memref<4x1xi32, #tpu.memory_space<vmem>>, vector<4x1xi32>
    %c0_5 = arith.constant 0 : index
    %c0_6 = arith.constant 0 : index
    %3 = vector.load %arg5[%c0_5, %c0_6] : memref<1x256xi32, #tpu.memory_space<vmem>>, vector<1x256xi32>
    %cst = arith.constant 0.000000e+00 : f32
    %4 = vector.broadcast %cst : f32 to vector<4x256xf32>
    %c0_7 = arith.constant 0 : index
    %c0_8 = arith.constant 0 : index
    %c3 = arith.constant 3 : index
    %5 = vector.load %arg1[%c0_7, %c0_8, %c3] : memref<1x4x262xf32, #tpu.memory_space<vmem>>, vector<1x4x256xf32>
    %6 = vector.shape_cast %5 : vector<1x4x256xf32> to vector<4x256xf32>
    %c0_i32 = arith.constant 0 : i32
    %7 = vector.broadcast %c0_i32 : i32 to vector<4x1xi32>
    %8 = arith.cmpi eq, %2, %7 : vector<4x1xi32>
    %c0_i32_9 = arith.constant 0 : i32
    %9 = vector.broadcast %c0_i32_9 : i32 to vector<1x256xi32>
    %10 = arith.addi %3, %9 : vector<1x256xi32>
    %c0_i32_10 = arith.constant 0 : i32
    %11 = vector.broadcast %c0_i32_10 : i32 to vector<1x256xi32>
    %12 = arith.cmpi sge, %10, %11 : vector<1x256xi32>
    %13 = vector.broadcast %8 : vector<4x1xi1> to vector<4x256xi1>
    %14 = vector.broadcast %12 : vector<1x256xi1> to vector<4x256xi1>
    %15 = arith.andi %13, %14 : vector<4x256xi1>
    %c0_i32_11 = arith.constant 0 : i32
    %16 = vector.broadcast %c0_i32_11 : i32 to vector<1x256xi32>
    %17 = arith.addi %3, %16 : vector<1x256xi32>
    %c16_i32 = arith.constant 16 : i32
    %18 = vector.broadcast %c16_i32 : i32 to vector<1x256xi32>
    %19 = arith.cmpi slt, %17, %18 : vector<1x256xi32>
    %20 = vector.broadcast %19 : vector<1x256xi1> to vector<4x256xi1>
    %21 = arith.andi %15, %20 : vector<4x256xi1>
    %22 = arith.select %21, %6, %4 : vector<4x256xi1>, vector<4x256xf32>
    %c0_12 = arith.constant 0 : index
    %c0_13 = arith.constant 0 : index
    %c4 = arith.constant 4 : index
    %23 = vector.load %arg1[%c0_12, %c0_13, %c4] : memref<1x4x262xf32, #tpu.memory_space<vmem>>, vector<1x4x256xf32>
    %24 = vector.shape_cast %23 : vector<1x4x256xf32> to vector<4x256xf32>
    %c1_i32 = arith.constant 1 : i32
    %25 = vector.broadcast %c1_i32 : i32 to vector<4x1xi32>
    %26 = arith.cmpi eq, %2, %25 : vector<4x1xi32>
    %c1_i32_14 = arith.constant 1 : i32
    %27 = vector.broadcast %c1_i32_14 : i32 to vector<1x256xi32>
    %28 = arith.addi %3, %27 : vector<1x256xi32>
    %c0_i32_15 = arith.constant 0 : i32
    %29 = vector.broadcast %c0_i32_15 : i32 to vector<1x256xi32>
    %30 = arith.cmpi sge, %28, %29 : vector<1x256xi32>
    %31 = vector.broadcast %26 : vector<4x1xi1> to vector<4x256xi1>
    %32 = vector.broadcast %30 : vector<1x256xi1> to vector<4x256xi1>
    %33 = arith.andi %31, %32 : vector<4x256xi1>
    %c1_i32_16 = arith.constant 1 : i32
    %34 = vector.broadcast %c1_i32_16 : i32 to vector<1x256xi32>
    %35 = arith.addi %3, %34 : vector<1x256xi32>
    %c16_i32_17 = arith.constant 16 : i32
    %36 = vector.broadcast %c16_i32_17 : i32 to vector<1x256xi32>
    %37 = arith.cmpi slt, %35, %36 : vector<1x256xi32>
    %38 = vector.broadcast %37 : vector<1x256xi1> to vector<4x256xi1>
    %39 = arith.andi %33, %38 : vector<4x256xi1>
    %40 = arith.select %39, %24, %22 : vector<4x256xi1>, vector<4x256xf32>
    %c0_18 = arith.constant 0 : index
    %c0_19 = arith.constant 0 : index
    %c5 = arith.constant 5 : index
    %41 = vector.load %arg1[%c0_18, %c0_19, %c5] : memref<1x4x262xf32, #tpu.memory_space<vmem>>, vector<1x4x256xf32>
    %42 = vector.shape_cast %41 : vector<1x4x256xf32> to vector<4x256xf32>
    %c2_i32 = arith.constant 2 : i32
    %43 = vector.broadcast %c2_i32 : i32 to vector<4x1xi32>
    %44 = arith.cmpi eq, %2, %43 : vector<4x1xi32>
    %c2_i32_20 = arith.constant 2 : i32
    %45 = vector.broadcast %c2_i32_20 : i32 to vector<1x256xi32>
    %46 = arith.addi %3, %45 : vector<1x256xi32>
    %c0_i32_21 = arith.constant 0 : i32
    %47 = vector.broadcast %c0_i32_21 : i32 to vector<1x256xi32>
    %48 = arith.cmpi sge, %46, %47 : vector<1x256xi32>
    %49 = vector.broadcast %44 : vector<4x1xi1> to vector<4x256xi1>
    %50 = vector.broadcast %48 : vector<1x256xi1> to vector<4x256xi1>
    %51 = arith.andi %49, %50 : vector<4x256xi1>
    %c2_i32_22 = arith.constant 2 : i32
    %52 = vector.broadcast %c2_i32_22 : i32 to vector<1x256xi32>
    %53 = arith.addi %3, %52 : vector<1x256xi32>
    %c16_i32_23 = arith.constant 16 : i32
    %54 = vector.broadcast %c16_i32_23 : i32 to vector<1x256xi32>
    %55 = arith.cmpi slt, %53, %54 : vector<1x256xi32>
    %56 = vector.broadcast %55 : vector<1x256xi1> to vector<4x256xi1>
    %57 = arith.andi %51, %56 : vector<4x256xi1>
    %58 = arith.select %57, %42, %40 : vector<4x256xi1>, vector<4x256xf32>
    %c0_24 = arith.constant 0 : index
    %c0_25 = arith.constant 0 : index
    %c6 = arith.constant 6 : index
    %59 = vector.load %arg1[%c0_24, %c0_25, %c6] : memref<1x4x262xf32, #tpu.memory_space<vmem>>, vector<1x4x256xf32>
    %60 = vector.shape_cast %59 : vector<1x4x256xf32> to vector<4x256xf32>
    %c3_i32 = arith.constant 3 : i32
    %61 = vector.broadcast %c3_i32 : i32 to vector<4x1xi32>
    %62 = arith.cmpi eq, %2, %61 : vector<4x1xi32>
    %c3_i32_26 = arith.constant 3 : i32
    %63 = vector.broadcast %c3_i32_26 : i32 to vector<1x256xi32>
    %64 = arith.addi %3, %63 : vector<1x256xi32>
    %c0_i32_27 = arith.constant 0 : i32
    %65 = vector.broadcast %c0_i32_27 : i32 to vector<1x256xi32>
    %66 = arith.cmpi sge, %64, %65 : vector<1x256xi32>
    %67 = vector.broadcast %62 : vector<4x1xi1> to vector<4x256xi1>
    %68 = vector.broadcast %66 : vector<1x256xi1> to vector<4x256xi1>
    %69 = arith.andi %67, %68 : vector<4x256xi1>
    %c3_i32_28 = arith.constant 3 : i32
    %70 = vector.broadcast %c3_i32_28 : i32 to vector<1x256xi32>
    %71 = arith.addi %3, %70 : vector<1x256xi32>
    %c16_i32_29 = arith.constant 16 : i32
    %72 = vector.broadcast %c16_i32_29 : i32 to vector<1x256xi32>
    %73 = arith.cmpi slt, %71, %72 : vector<1x256xi32>
    %74 = vector.broadcast %73 : vector<1x256xi1> to vector<4x256xi1>
    %75 = arith.andi %69, %74 : vector<4x256xi1>
    %76 = arith.select %75, %60, %58 : vector<4x256xi1>, vector<4x256xf32>
    %cst_30 = arith.constant dense<0.000000e+00> : vector<8x256xf32>
    %77 = tpu.matmul %0, %76, %cst_30 {dimension_numbers = #tpu.dot_dimension_numbers<[1], [0], [0], [1], [0, 0, 1, 1], [], []>} : vector<8x4xf32>, vector<4x256xf32>, vector<8x256xf32> -> vector<8x256xf32>
    %78 = vector.broadcast %1 : vector<8x1xf32> to vector<8x256xf32>
    %79 = arith.addf %77, %78 : vector<8x256xf32>
    %c0_31 = arith.constant 0 : index
    %c0_32 = arith.constant 0 : index
    %c0_33 = arith.constant 0 : index
    %80 = vector.load %arg6[%c0_31, %c0_32, %c0_33] : memref<1x8x256xf32, #tpu.memory_space<vmem>>, vector<1x8x256xf32>
    %81 = vector.shape_cast %80 : vector<1x8x256xf32> to vector<8x256xf32>
    %82 = vector.shape_cast %79 : vector<8x256xf32> to vector<1x8x256xf32>
    tpu.vector_store %arg6[%c0_31, %c0_32, %c0_33], %82 {strides = array<i32>} : memref<1x8x256xf32, #tpu.memory_space<vmem>>, vector<1x8x256xf32>,
    return
  }
  func.func @transform_0(%arg0: i32) -> (i32, i32, i32) {
    %c0_i32 = arith.constant 0 : i32
    %c0_i32_0 = arith.constant 0 : i32
    %c0_i32_1 = arith.constant 0 : i32
    return %arg0, %c0_i32, %c0_i32_0 : i32, i32, i32
  }
  func.func @transform_1(%arg0: i32) -> (i32, i32) {
    %c0_i32 = arith.constant 0 : i32
    %c0_i32_0 = arith.constant 0 : i32
    %c0_i32_1 = arith.constant 0 : i32
    return %c0_i32, %c0_i32_0 : i32, i32
  }
  func.func @transform_2(%arg0: i32) -> (i32, i32) {
    %c0_i32 = arith.constant 0 : i32
    %c0_i32_0 = arith.constant 0 : i32
    %c0_i32_1 = arith.constant 0 : i32
    return %c0_i32, %c0_i32_0 : i32, i32
  }
  func.func @transform_3(%arg0: i32) -> (i32, i32) {
    %c0_i32 = arith.constant 0 : i32
    %c0_i32_0 = arith.constant 0 : i32
    %c0_i32_1 = arith.constant 0 : i32
    return %c0_i32, %c0_i32_0 : i32, i32
  }
  func.func @transform_4(%arg0: i32) -> (i32, i32) {
    %c0_i32 = arith.constant 0 : i32
    %c0_i32_0 = arith.constant 0 : i32
    %c0_i32_1 = arith.constant 0 : i32
    return %c0_i32, %c0_i32_0 : i32, i32
  }
  func.func @transform_5(%arg0: i32) -> (i32, i32, i32) {
    %c0_i32 = arith.constant 0 : i32
    %c0_i32_0 = arith.constant 0 : i32
    %c0_i32_1 = arith.constant 0 : i32
    return %arg0, %c0_i32, %c0_i32_0 : i32, i32, i32
  }
}

</mosaic_0001>

<bundles_post_ra>
// kernel: cyclefc_forward.1
= control target key start
LH: loop header
LB: loop body
LE: loop exit
PB: predicated region body
PF: predicated region fallthrough
CT: control target
= control target key end

     0   :  { %s600_s18 = smov 0   ;;  %s809_s0 = inlined_call_operand.vmem [shape: f32[2,4,262], index: 0, kind: input, shape index: {}]   ;;  %s810_s1 = inlined_call_operand.vmem [shape: f32[8,4], index: 1, kind: input, shape index: {}]   ;;  %s811_s2 = inlined_call_operand.vmem [shape: f32[8,1], index: 2, kind: input, shape index: {}]   ;;  %s812_s3 = inlined_call_operand.vmem [shape: s32[4,1], index: 3, kind: input, shape index: {}]   ;;  %s813_s4 = inlined_call_operand.vmem [shape: s32[1,256], index: 4, kind: input, shape index: {}]   ;;  %s814_s5 = inlined_call_operand.vmem [shape: f32[2,8,256], index: 5, kind: output, shape index: {}]  }
   0x1 LB: > { %s525_s19 = sadd.s32 4294967295, %s563_s18   ;;  %p529_p0 = scmp.ge.s32.totalorder %s563_s18, 1  ;;  %s563_s18 = sphi %s600_s18, %s15_s18  }
   0x2   : > { %p187_p1 = scmp.lt.s32.totalorder %s563_s18, 3 }
   0x4   : > { %p188_p2 = pnand %p529_p0, %p187_p1 }
   0x5   : > { %p215_p3 = scmp.lt.s32.totalorder (!%p188_p2), %s525_s19, 1  ;;  %s566_s26 = smov (!%p188_p2), 125  }
   0x6   : > { %191 = sbr.rel (%p188_p2) target bundleno = 303 (0x12f), region = 40  ;;  %s567_s27 = smov (!%p188_p2), 124  }
   0x7   : > { %s568_s28 = smov (!%p188_p2), 123   ;;  %s569_s29 = smov (!%p188_p2), 122  }
   0xb   : > { %v227_v0 = vld [vmem:[%s812_s3] sm:$0xf]  ;;  %v565_v1 = vmov 0   ;;  %s864_s19 = smov (!%p215_p3, %s525_s19), 1 }
   0xc   : > { %554 = vset.pattern.permute.xlu0 %v565_v1  ;;  %vm231_vm0 = vcmp.eq.s32.totalorder %v227_v0, 0  ;;  %555 = vset.pattern.permute.xlu2 %v565_v1  ;;  %vm322_vm1 = vcmp.eq.s32.totalorder %v227_v0, 2  ;;  %s540_s22 = smul.u32 12, %s864_s19  ;;  %vm276_vm2 = vcmp.eq.s32.totalorder %v227_v0, 1  ;;  %vm368_vm3 = vcmp.eq.s32.totalorder %v227_v0, 3  ;;  %v226_v31 = vld [vmem:[%s811_s2] sm:$0xff] }
   0xd   : > { %v233_v2 = vsel %vm231_vm0, 1, %v565_v1  ;;  %v325_v3 = vsel %vm322_vm1, 1, %v565_v1  ;;  %556 = vset.pattern.permute.xlu1 %v565_v1  ;;  %v279_v6 = vsel %vm276_vm2, 1, %v565_v1  ;;  %v371_v10 = vsel %vm368_vm3, 1, %v565_v1  ;;  %v228_v27 = vld [vmem:[%s813_s4] sm:$0x3] }
   0xe   : > { %235 = vperm.xlu0 %554, %v233_v2   ;;  %327 = vperm.xlu2 %555, %v325_v3   ;;  %s219_s25 = scalar_lea.vmem %s809_s0, %s540_s22  ;;  %v323_v28 = vadd.s32 2, %v228_v27  ;;  %v277_v33 = vadd.s32 1, %v228_v27  ;;  %vm232_vm5 = vcmp.ge.s32.totalorder %v228_v27, 0  ;;  %v369_v35 = vadd.s32 3, %v228_v27  ;;  %s539_s11 = sshll.u32 %s864_s19, 4 }
   0xf   : > { %v229_v4 = vld [vmem:[%s219_s25] sm:$0xff]  ;;  %v230_v5 = vld [vmem:[%s219_s25 + $0x8] sm:$0xf]  ;;  %v238_v37 = vsel %vm232_vm5, 1, %v565_v1  ;;  %vm245_vm8 = vcmp.lt.s32.totalorder %v228_v27, 16  ;;  %v829_v0 = vmov 0  ;;  %s224_s14 = scalar_lea.vmem %s814_s5, %s539_s11 }
  0x10   : > { %255 = vst [vmem:[#allocation1] ss:$2 sm:$0xff] %v229_v4  ;;  %v275_v7 = vld [vmem:[%s219_s25 + $0x8] sm:$0xf]  ;;  %vm324_vm4 = vcmp.ge.s32.totalorder %v323_v28, 0  ;;  %vm337_vm6 = vcmp.lt.s32.totalorder %v323_v28, 16 }
  0x11   : > { %257 = vst [vmem:[#allocation1 + $0x10] ss:$2 sm:$0xff] %v230_v5  ;;  %v321_v12 = vld [vmem:[%s219_s25 + $0x8] sm:$0xf]  ;;  %v330_v34 = vsel %vm324_vm4, 1, %v565_v1  ;;  %v645_v39 = vsel %vm337_vm6, 1, %v565_v1 }
  0x12   : > { %v367_v16 = vld [vmem:[%s219_s25 + $0x8] sm:$0xf]  ;;  %v332_v38 = vperm.slane %v330_v34, 1  ;;  %vm278_vm7 = vcmp.ge.s32.totalorder %v277_v33, 0  ;;  %vm370_vm9 = vcmp.ge.s32.totalorder %v369_v35, 0  ;;  %v240_v41 = vperm.slane %v238_v37, 1 }
  0x13   : > { %v340_v42 = vperm.slane %v645_v39, 1  ;;  %v284_v43 = vsel %vm278_vm7, 1, %v565_v1  ;;  %vm291_vm10 = vcmp.lt.s32.totalorder %v277_v33, 16  ;;  %v246_v44 = vsel %vm245_vm8, 1, %v565_v1  ;;  %v225_v27 = vld [vmem:[%s810_s1] sm:$0xff] }
  0x14   : > { %v331_v45 = vperm.slane %v330_v34, 0  ;;  %vm334_vm11 = vcmp.eq.s32.totalorder %v332_v38, 1  ;;  %v239_v46 = vperm.slane %v238_v37, 0  ;;  %v376_v47 = vsel %vm370_vm9, 1, %v565_v1 }
  0x15   : > { %vm383_vm13 = vcmp.lt.s32.totalorder %v369_v35, 16  ;;  %v286_v49 = vperm.slane %v284_v43, 1  ;;  %v292_v50 = vsel %vm291_vm10, 1, %v565_v1  ;;  %vm656_vm14 = vcmp.eq.s32.totalorder %v240_v41, 1 }
  0x16   : > { %281 = vperm.xlu0 %554, %v279_v6   ;;  %v248_v53 = vperm.slane %v246_v44, 1  ;;  %vm660_vm15 = vcmp.eq.s32.totalorder %v340_v42, 1  ;;  %vm333_vm2 = vcmp.eq.s32.totalorder %v331_v45, 1  ;;  %v378_v56 = vperm.slane %v376_v47, 1 }
  0x17   : > { %v258_v8 = vld.sshfl [vmem:[#allocation1] sm:$0xff pattern:$0x75316420]  ;;  %v259_v9 = vld.sshfl [vmem:[#allocation1 + $0x8] sm:$0xff pattern:$0x75316420] }
  0x18   : > { %261 = vrot.lane.b32.xlu1 %v258_v8, %s566_s26  ;;  %301 = vst [vmem:[#allocation1] ss:$2 sm:$0xff] %v229_v4  ;;  %v260_v11 = vld.sshfl [vmem:[#allocation1 + $0x10] sm:$0xff pattern:$0x75316420]  ;;  %v384_v57 = vsel %vm383_vm13, 1, %v565_v1 }
  0x19   : > { %303 = vst [vmem:[#allocation1 + $0x10] ss:$2 sm:$0xff] %v275_v7  ;;  %265 = vrot.lane.b32.xlu2 %v260_v11, %s566_s26  ;;  %vm241_vm3 = vcmp.eq.s32.totalorder %v239_v46, 1  ;;  %v294_v58 = vperm.slane %v292_v50, 1  ;;  %v285_v60 = vperm.slane %v284_v43, 0  ;;  %vm674_vm5 = vcmp.eq.s32.totalorder %v286_v49, 1 }
  0x1a   : > { %vm679_vm8 = vcmp.eq.s32.totalorder %v248_v53, 1  ;;  %v386_v1 = vperm.slane %v384_v57, 1  ;;  %v247_v2 = vperm.slane %v246_v44, 0  ;;  %vm380_vm4 = vcmp.eq.s32.totalorder %v378_v56, 1 }
  0x1b   : > { %vm701_vm6 = vcmp.eq.s32.totalorder %v294_v58, 1  ;;  %v377_v7 = vperm.slane %v376_v47, 0  ;;  %v339_v11 = vperm.slane %v645_v39, 0 }
  0x1e   : > { %373 = vperm.xlu0 %554, %v371_v10  }
  0x1f   : > { %v304_v13 = vld.sshfl [vmem:[#allocation1] sm:$0xff pattern:$0x75316420]  ;;  %v305_v14 = vld.sshfl [vmem:[#allocation1 + $0x8] sm:$0xff pattern:$0x75316420] }
  0x20   : > { %263 = vrot.lane.b32.xlu1 %v259_v9, %s566_s26  ;;  %347 = vst [vmem:[#allocation1] ss:$2 sm:$0xff] %v229_v4  ;;  %v306_v15 = vld.sshfl [vmem:[#allocation1 + $0x10] sm:$0xff pattern:$0x75316420] }
  0x21   : > { %349 = vst [vmem:[#allocation1 + $0x10] ss:$2 sm:$0xff] %v321_v12  ;;  %311 = vrot.lane.b32.xlu2 %v306_v15, %s567_s27 }
  0x26   : > { %307 = vrot.lane.b32.xlu0 %v304_v13, %s567_s27 }
  0x27   : > { %v350_v17 = vld.sshfl [vmem:[#allocation1] sm:$0xff pattern:$0x75316420]  ;;  %v351_v18 = vld.sshfl [vmem:[#allocation1 + $0x8] sm:$0xff pattern:$0x75316420] }
  0x28   : > { %309 = vrot.lane.b32.xlu1 %v305_v14, %s567_s27  ;;  %v352_v19 = vld.sshfl [vmem:[#allocation1 + $0x10] sm:$0xff pattern:$0x75316420]  ;;  %393 = vst [vmem:[#allocation1] ss:$2 sm:$0xff] %v229_v4  ;;  %v293_v4 = vperm.slane %v292_v50, 0 }
  0x29   : > { %395 = vst [vmem:[#allocation1 + $0x10] ss:$2 sm:$0xff] %v367_v16  ;;  %355 = vrot.lane.b32.xlu2 %v351_v18, %s568_s28 }
  0x2e   : > { %357 = vrot.lane.b32.xlu0 %v352_v19, %s568_s28 }
  0x2f   : > { %v397_v20 = vld.sshfl [vmem:[#allocation1 + $0x8] sm:$0xff pattern:$0x75316420]  ;;  %v396_v22 = vld.sshfl [vmem:[#allocation1] sm:$0xff pattern:$0x75316420] }
  0x30   : > { %353 = vrot.lane.b32.xlu1 %v350_v17, %s568_s28  ;;  %v398_v21 = vld.sshfl [vmem:[#allocation1 + $0x10] sm:$0xff pattern:$0x75316420]  ;;  %v385_v17 = vperm.slane %v384_v57, 0 }
  0x31   : > { %401 = vrot.lane.b32.xlu2 %v397_v20, %s569_s29 }
  0x36   : > { %403 = vrot.lane.b32.xlu0 %v398_v21, %s569_s29 }
  0x38   : > { %399 = vrot.lane.b32.xlu1 %v396_v22, %s569_s29 }
  0x40   : > { %414 = vperm.xlu1 %556, %v226_v31  }
  0x68   : > { %v328_v23 = vpop.permute.xlu2 %327 }
  0x69   : > { %vm329_vm12 = vcmp.eq.s32.totalorder %v328_v23, 1 }
  0x6a   : > { %vm665_vm0 = vmand %vm329_vm12, %vm334_vm11  ;;  %vm815_vm11 = vcmask 1014784  }
  0x6b   : > { %vm691_vm10 = vmand %vm329_vm12, %vm333_vm2 }
  0x6c   : > { %v830_v0 = vsel %vm691_vm10, 4294967295, %v829_v0  ;;  %vm421_vm10 = vcmask 1043456  }
  0x73   : > { %v626_v26 = vpop.permute.xlu2 %265 }
  0x7b   : > { %v638_v32 = vpop.permute.xlu2 %311 }
  0x80   : > { %v236_v24 = vpop.permute.xlu0 %235 }
  0x81   : > { %vm237_vm1 = vcmp.eq.s32.totalorder %v236_v24, 1 }
  0x82   : > { %vm686_vm9 = vmand %vm237_vm1, %vm656_vm14  ;;  %vm287_vm14 = vcmp.eq.s32.totalorder %v285_v60, 1 }
  0x83   : > { %v653_v48 = vpop.permute.xlu2 %355  ;;  %vm696_vm13 = vmand %vm237_vm1, %vm241_vm3  ;;  %vm838_vm1 = vcmask 1022976  }
  0x84   : > { %vm252_vm3 = vmand %vm686_vm9, %vm679_vm8  ;;  %vm735_vm9 = vcmp.eq.s32.totalorder %v247_v2, 1  ;;  %vm753_vm8 = vcmp.eq.s32.totalorder %v377_v7, 1 }
  0x88   : > { %v624_v25 = vpop.permute.xlu0 %281 }
  0x89   : > { %vm835_vm12 = vcmp.eq.s32.totalorder %v624_v25, 1 }
  0x8a   : > { %v631_v29 = vpop.permute.xlu1 %261  ;;  %vm709_vm2 = vmand %vm835_vm12, %vm674_vm5  ;;  %vm723_vm5 = vcmp.eq.s32.totalorder %v386_v1, 1 }
  0x8b   : > { %v402_v15 = vpop.permute.xlu2 %401 }
  0x90   : > { %v633_v30 = vpop.permute.xlu0 %373 }
  0x91   : > { %vm816_vm7 = vcmp.eq.s32.totalorder %v633_v30, 1 }
  0x92   : > { %v641_v36 = vpop.permute.xlu1 %263  ;;  %vm729_vm12 = vmand %vm816_vm7, %vm380_vm4  ;;  %vm743_vm4 = vcmp.eq.s32.totalorder %v293_v4, 1  ;;  %vm848_vm7 = vcmp.eq.s32.totalorder %v624_v25, 1 }
  0x93   : > { %v269_v8 = vsel %vm838_vm1, %v641_v36, %v626_v26  ;;  %vm843_vm1 = vcmask 1006592  }
  0x94   : > { %v273_v18 = vsel %vm252_vm3, %v269_v8, 0.0  ;;  %vm251_vm3 = vmand %vm696_vm13, %vm735_vm9  ;;  %vm861_vm9 = vnez %v830_v0 }
  0x98   : > { %v647_v40 = vpop.permute.xlu0 %307 }
  0x9a   : > { %v310_v51 = vpop.permute.xlu1 %309 }
  0x9b   : > { %v315_v9 = vsel %vm815_vm11, %v310_v51, %v638_v32  ;;  %vm298_vm11 = vmand %vm709_vm2, %vm701_vm6  ;;  %vm853_vm2 = vcmask 1022976  }
  0x9c   : > { %v319_v22 = vsel %vm298_vm11, %v315_v9, %v273_v18  ;;  %vm390_vm6 = vmand %vm729_vm12, %vm723_vm5  ;;  %v268_v24 = vsel %vm853_vm2, %v631_v29, %v641_v36  ;;  %vm417_vm11 = vcmask 31744   ;;  %vm777_vm5 = vcmp.eq.s32.totalorder %v339_v11, 1 }
  0x9d   : > { %vm858_vm12 = vcmask 1014784   ;;  %v272_v33 = vsel %vm251_vm3, %v268_v24, 0.0 }
  0x9e   : > { %v314_v29 = vsel %vm858_vm12, %v647_v40, %v310_v51 }
  0xa0   : > { %v358_v59 = vpop.permute.xlu0 %357 }
  0xa1   : > { %v361_v14 = vsel %vm843_vm1, %v653_v48, %v358_v59  ;;  %vm749_vm1 = vmand %vm848_vm7, %vm287_vm14  ;;  %vm854_vm7 = vcmask 998400  }
  0xa2   : > { %v354_v10 = vpop.permute.xlu1 %353  ;;  %vm855_vm14 = vmand %vm665_vm0, %vm660_vm15  ;;  %vm387_vm15 = vcmp.eq.s32.totalorder %v385_v17, 1  ;;  %vm859_vm0 = vcmp.eq.s32.totalorder %v633_v30, 1 }
  0xa3   : > { %v365_v26 = vsel %vm855_vm14, %v361_v14, %v319_v22  ;;  %vm381_vm2 = vmand %vm859_vm0, %vm753_vm8  ;;  %vm862_vm14 = vcmask 998400  }
  0xa4   : > { %vm297_vm13 = vmand %vm749_vm1, %vm743_vm4 }
  0xa5   : > { %v318_v30 = vsel %vm297_vm13, %v314_v29, %v272_v33  ;;  %vm389_vm8 = vmand %vm381_vm2, %vm387_vm15 }
  0xa8   : > { %v404_v23 = vpop.permute.xlu0 %403 }
  0xa9   : > { %v407_v25 = vsel %vm854_vm7, %v402_v15, %v404_v23  ;;  %vm860_vm7 = vcmask 1006592  }
  0xaa   : > { %v411_v31 = vsel %vm390_vm6, %v407_v25, %v365_v26  ;;  %v360_v32 = vsel %vm860_vm7, %v354_v10, %v653_v48  ;;  %vm343_vm6 = vmand %vm861_vm9, %vm777_vm5  ;;  %v400_v34 = vpop.permute.xlu1 %399 }
  0xab   : > { %535 = vmatpush.msk.msra.mxu1 %vm421_vm10, %v411_v31  ;;  %v406_v35 = vsel %vm862_vm14, %v400_v34, %v402_v15  ;;  %v364_v36 = vsel %vm343_vm6, %v360_v32, %v318_v30 }
  0xac   : > { %536 = vmatmul.msk.f32.vlgmr.msra.gmra.mxu1 %vm417_vm11, %v225_v27  ;;  %v410_v37 = vsel %vm389_vm8, %v406_v35, %v364_v36 }
  0xad   : > { %533 = vmatpush.msk.msra.mxu0 %vm421_vm10, %v410_v37 }
  0xae   : > { %534 = vmatmul.msk.f32.vlgmr.msra.gmra.mxu0 %vm417_vm11, %v225_v27 }
  0xb2   : > { %v415_v38 = vpop.permute.xlu1 %414 }
 0x129   : > { %v465_v39 = vpop.f32.mrf.mxu1 }
 0x12a   : > { %v466_v40 = vadd.f32 %v465_v39, %v415_v38 }
 0x12b   : > { %v445_v41 = vpop.f32.mrf.mxu0 }
 0x12c   : > { %469 = vst [vmem:[%s224_s14 + $0x8] sm:$0xff] %v466_v40  ;;  %v446_v42 = vadd.f32 %v445_v41, %v415_v38 }
 0x12e   : > { %468 = vst [vmem:[%s224_s14] sm:$0xff] %v446_v42 }
 0x12f PF: > { %s15_s18 = sadd.s32 1, %s563_s18  }
 0x130   : > { %p12_p4 = scmp.ge.s32.totalorder %s15_s18, 4  }
 0x132   :  { %14 = sbr.rel (!%p12_p4) target bundleno = 1 (0x1), region = 74 }

</bundles_post_ra>
